<compile_context>
chip_gen: v7x
topology: tpu7x:2x2x1
jax: 0.10.0
libtpu: 0.0.40
codegen_flags: <defaults>
</compile_context>

<pallas_src>
import functools

import jax
import jax.numpy as jnp
from jax.experimental import pallas as pl
from jax.experimental.pallas import tpu as pltpu

TEMPERATURE = 3.0

_LANE = 128
_PAD_NEG = -1e30   # finite "minus infinity" for padded classes (bf16-safe)


def _okd_kernel(x_ref, out_ref, *, batch, num_experts, classes_padded):
    """x_ref: [TB, E*Cp] native dtype (VMEM); out_ref: [1, 1] f32 (SMEM)."""
    tb = x_ref.shape[0]
    E = num_experts
    Cp = classes_padded
    inv_t = jnp.float32(1.0 / TEMPERATURE)

    def lse(v):                                    # [TB, Cp] -> [TB, 1]
        m = jnp.max(v, axis=-1, keepdims=True)
        return m + jnp.log(jnp.sum(jnp.exp(v - m), axis=-1, keepdims=True))

    # Experts live on the lane axis as static 128-aligned slices (E is small,
    # the Python loop unrolls); the expert sum is E-1 plain VPU adds.
    x0 = x_ref[:, 0:Cp].astype(jnp.float32) * inv_t
    s = x0                                         # running sum over experts
    lse_sum = lse(x0)                              # running sum of per-expert lse
    for e in range(1, E):
        xe = x_ref[:, e * Cp:(e + 1) * Cp].astype(jnp.float32) * inv_t
        s = s + xe
        lse_sum = lse_sum + lse(xe)

    # Exact collapse of the ensemble-softmax KL terms:
    #   sum_e sum_c p_ens * (log p_ens - log q_e)
    #     = sum_e lse_c(x_e) - E * lse_c(mean_e x_e)
    ens_lse = lse(s * jnp.float32(1.0 / E))
    per_row = lse_sum - jnp.float32(E) * ens_lse   # [TB, 1]

    # Mask undefined rows of a partial last tile BEFORE the tile-level sum.
    if batch % tb != 0:
        row = jax.lax.broadcasted_iota(jnp.int32, (tb, 1), 0)
        valid = (pl.program_id(0) * tb + row) < batch
        per_row = jnp.where(valid, per_row, jnp.float32(0.0))

    out_ref[0, 0] = jnp.sum(per_row)


def _choose_tb(B, E, Cp, in_bytes):
    """Batch-tile rows sized against an explicit VMEM footprint."""
    budget = 40 * 1024 * 1024                      # fits under the 48 MiB limit
    # 2x double-buffered native-dtype input block + ~4 f32 [TB, Cp] temps.
    per_row = E * Cp * 2 * in_bytes + 4 * Cp * 4
    tb = budget // max(per_row, 1)
    tb = min(tb, 1024)                             # diminishing returns past ~512-1024
    if B >= 16:
        tb = min(tb, pl.cdiv(B, 2))                # >= 2 tiles: both v7x TCs get work
    if tb >= B:
        return B                                   # single full-extent block
    tb = max(8, (tb // 8) * 8)                     # sublane-aligned tile
    for cand in range(tb, max(8, tb // 2) - 1, -8):
        if B % cand == 0:
            return cand                            # divisor of B: mask compiles away
    return tb


def okd_loss(expert_logits, *, tb=None):
    """expert_logits: [B, E, C] (any float dtype; bf16 recommended — the kernel
    is HBM-bound, so bf16 at the pallas_call boundary halves bytes moved).

    Returns scalar float32 loss identical to OnlineKnowledgeDistillationLoss.
    """
    B, E, C = expert_logits.shape
    in_bytes = jnp.dtype(expert_logits.dtype).itemsize

    # Lane-align the class axis so per-expert slices are 128-lane aligned.
    # Pad value is a huge negative => exp underflows to 0, lse unaffected.
    Cp = C if C % _LANE == 0 else ((C + _LANE - 1) // _LANE) * _LANE
    if Cp != C:
        expert_logits = jnp.pad(
            expert_logits, ((0, 0), (0, 0), (0, Cp - C)),
            constant_values=_PAD_NEG)

    # [B, E, Cp] -> [B, E*Cp]: contiguous reshape (free); keeps E off the
    # sublane axis so small expert counts don't pad sublanes 2x.
    x2d = expert_logits.reshape(B, E * Cp)

    if tb is None:
        tb = _choose_tb(B, E, Cp, in_bytes)
    tb = max(1, min(int(tb), B))
    num_tiles = pl.cdiv(B, tb)

    kernel = functools.partial(_okd_kernel, batch=B, num_experts=E,
                               classes_padded=Cp)

    cost = pl.CostEstimate(
        flops=8 * B * E * Cp,
        transcendentals=B * (E + 1) * Cp,
        bytes_accessed=B * E * Cp * in_bytes + num_tiles * 4,
    )

    partials = pl.pallas_call(
        kernel,
        out_shape=jax.ShapeDtypeStruct((num_tiles, 1), jnp.float32),
        grid_spec=pltpu.PrefetchScalarGridSpec(
            num_scalar_prefetch=0,
            grid=(num_tiles,),
            in_specs=[pl.BlockSpec((tb, E * Cp), lambda i: (i, 0))],
            out_specs=pl.BlockSpec((1, 1), lambda i: (i, 0),
                                   memory_space=pltpu.MemorySpace.SMEM),
        ),
        compiler_params=pltpu.CompilerParams(
            dimension_semantics=("parallel",),
            # Explicit limit: safe on v7x (64 MiB VMEM/TC), raises the v5e
            # 16 MiB default so the large-TB regime is reachable everywhere.
            vmem_limit_bytes=48 * 1024 * 1024,
        ),
        cost_estimate=cost,
    )(x2d)

    return jnp.sum(partials) / jnp.float32(B * E)


def okd_loss_reference(expert_logits, temperature=TEMPERATURE):
    """Pure-JAX reference mirroring the PyTorch module exactly."""
    x = expert_logits.astype(jnp.float32) / temperature
    B, E, C = x.shape
    ens = jnp.mean(x, axis=1)
    p_ens = jax.nn.softmax(ens, axis=1)
    total = 0.0
    for i in range(E):
        log_q = jax.nn.log_softmax(x[:, i, :], axis=1)
        kl = jnp.sum(p_ens * (jnp.log(p_ens) - log_q)) / B   # batchmean
        total = total + kl
    return total / E


if __name__ == "__main__":
    key = jax.random.PRNGKey(0)
    k1, k2 = jax.random.split(key)

    # --- small test (single full-extent tile; C=16 exercises class padding) ---
    B, E, C = 2, 4, 16
    x_small = jax.random.normal(k1, (B, E, C), dtype=jnp.float32) * 2.0
    loss = okd_loss(x_small)
    jax.block_until_ready(loss)
    ref = okd_loss_reference(x_small)
    assert jnp.allclose(loss, ref, atol=1e-5, rtol=1e-5), (loss, ref)

    # --- multi-tile test with a partial last tile (grid + row masking) ---
    B2, E2, C2 = 300, 4, 256
    x_big = jax.random.normal(k2, (B2, E2, C2), dtype=jnp.float32) * 2.0
    loss_big = okd_loss(x_big, tb=128)             # 3 tiles, last one partial
    jax.block_until_ready(loss_big)
    ref_big = okd_loss_reference(x_big)
    assert jnp.allclose(loss_big, ref_big, atol=1e-5, rtol=1e-4), (loss_big, ref_big)

    # --- bf16 input (native-dtype HBM blocks, f32 upcast fused in-kernel) ---
    x_bf16 = x_small.astype(jnp.bfloat16)
    loss_bf16 = okd_loss(x_bf16)
    jax.block_until_ready(loss_bf16)
    ref_bf16 = okd_loss_reference(x_bf16)
    assert jnp.allclose(loss_bf16, ref_bf16, atol=1e-5, rtol=1e-4), (loss_bf16, ref_bf16)

    print("KERNEL_OK")
</pallas_src>

<mosaic_0001>
module attributes {stable_mosaic.version = 11 : i64} {
  func.func @_okd_kernel(%arg0: i32, %arg1: memref<2x512xf32, #tpu.memory_space<vmem>>, %arg2: memref<1x1xf32, #tpu.memory_space<smem>>) attributes {dimension_semantics = [#tpu.dimension_semantics<parallel>], iteration_bounds = array<i64: 1>, scalar_prefetch = 0 : i64, scratch_operands = 0 : i64, tpu.core_type = #tpu.core_type<tc>, window_params = [{transform_indices = @transform_0, window_bounds = array<i64: 2, 512>}, {transform_indices = @transform_1, window_bounds = array<i64: 1, 1>}]} {
    %c0 = arith.constant 0 : index
    %c0_0 = arith.constant 0 : index
    %0 = vector.load %arg1[%c0, %c0_0] : memref<2x512xf32, #tpu.memory_space<vmem>>, vector<2x128xf32>
    %cst = arith.constant 0.333333343 : f32
    %1 = vector.broadcast %cst : f32 to vector<2x128xf32>
    %2 = arith.mulf %0, %1 : vector<2x128xf32>
    %cst_1 = arith.constant dense<0xFF800000> : vector<2xf32>
    %3 = vector.multi_reduction <maximumf>, %2, %cst_1 [1] : vector<2x128xf32> to vector<2xf32>
    %4 = vector.shape_cast %3 : vector<2xf32> to vector<2x1xf32>
    %5 = vector.broadcast %4 : vector<2x1xf32> to vector<2x128xf32>
    %6 = arith.subf %2, %5 : vector<2x128xf32>
    %7 = math.exp %6 : vector<2x128xf32>
    %cst_2 = arith.constant dense<0.000000e+00> : vector<2xf32>
    %8 = vector.multi_reduction <add>, %7, %cst_2 [1] : vector<2x128xf32> to vector<2xf32>
    %9 = vector.shape_cast %8 : vector<2xf32> to vector<2x1xf32>
    %10 = math.log %9 : vector<2x1xf32>
    %11 = arith.addf %4, %10 : vector<2x1xf32>
    %c0_3 = arith.constant 0 : index
    %c128 = arith.constant 128 : index
    %12 = vector.load %arg1[%c0_3, %c128] : memref<2x512xf32, #tpu.memory_space<vmem>>, vector<2x128xf32>
    %cst_4 = arith.constant 0.333333343 : f32
    %13 = vector.broadcast %cst_4 : f32 to vector<2x128xf32>
    %14 = arith.mulf %12, %13 : vector<2x128xf32>
    %15 = arith.addf %2, %14 : vector<2x128xf32>
    %cst_5 = arith.constant dense<0xFF800000> : vector<2xf32>
    %16 = vector.multi_reduction <maximumf>, %14, %cst_5 [1] : vector<2x128xf32> to vector<2xf32>
    %17 = vector.shape_cast %16 : vector<2xf32> to vector<2x1xf32>
    %18 = vector.broadcast %17 : vector<2x1xf32> to vector<2x128xf32>
    %19 = arith.subf %14, %18 : vector<2x128xf32>
    %20 = math.exp %19 : vector<2x128xf32>
    %cst_6 = arith.constant dense<0.000000e+00> : vector<2xf32>
    %21 = vector.multi_reduction <add>, %20, %cst_6 [1] : vector<2x128xf32> to vector<2xf32>
    %22 = vector.shape_cast %21 : vector<2xf32> to vector<2x1xf32>
    %23 = math.log %22 : vector<2x1xf32>
    %24 = arith.addf %17, %23 : vector<2x1xf32>
    %25 = arith.addf %11, %24 : vector<2x1xf32>
    %c0_7 = arith.constant 0 : index
    %c256 = arith.constant 256 : index
    %26 = vector.load %arg1[%c0_7, %c256] : memref<2x512xf32, #tpu.memory_space<vmem>>, vector<2x128xf32>
    %cst_8 = arith.constant 0.333333343 : f32
    %27 = vector.broadcast %cst_8 : f32 to vector<2x128xf32>
    %28 = arith.mulf %26, %27 : vector<2x128xf32>
    %29 = arith.addf %15, %28 : vector<2x128xf32>
    %cst_9 = arith.constant dense<0xFF800000> : vector<2xf32>
    %30 = vector.multi_reduction <maximumf>, %28, %cst_9 [1] : vector<2x128xf32> to vector<2xf32>
    %31 = vector.shape_cast %30 : vector<2xf32> to vector<2x1xf32>
    %32 = vector.broadcast %31 : vector<2x1xf32> to vector<2x128xf32>
    %33 = arith.subf %28, %32 : vector<2x128xf32>
    %34 = math.exp %33 : vector<2x128xf32>
    %cst_10 = arith.constant dense<0.000000e+00> : vector<2xf32>
    %35 = vector.multi_reduction <add>, %34, %cst_10 [1] : vector<2x128xf32> to vector<2xf32>
    %36 = vector.shape_cast %35 : vector<2xf32> to vector<2x1xf32>
    %37 = math.log %36 : vector<2x1xf32>
    %38 = arith.addf %31, %37 : vector<2x1xf32>
    %39 = arith.addf %25, %38 : vector<2x1xf32>
    %c0_11 = arith.constant 0 : index
    %c384 = arith.constant 384 : index
    %40 = vector.load %arg1[%c0_11, %c384] : memref<2x512xf32, #tpu.memory_space<vmem>>, vector<2x128xf32>
    %cst_12 = arith.constant 0.333333343 : f32
    %41 = vector.broadcast %cst_12 : f32 to vector<2x128xf32>
    %42 = arith.mulf %40, %41 : vector<2x128xf32>
    %43 = arith.addf %29, %42 : vector<2x128xf32>
    %cst_13 = arith.constant dense<0xFF800000> : vector<2xf32>
    %44 = vector.multi_reduction <maximumf>, %42, %cst_13 [1] : vector<2x128xf32> to vector<2xf32>
    %45 = vector.shape_cast %44 : vector<2xf32> to vector<2x1xf32>
    %46 = vector.broadcast %45 : vector<2x1xf32> to vector<2x128xf32>
    %47 = arith.subf %42, %46 : vector<2x128xf32>
    %48 = math.exp %47 : vector<2x128xf32>
    %cst_14 = arith.constant dense<0.000000e+00> : vector<2xf32>
    %49 = vector.multi_reduction <add>, %48, %cst_14 [1] : vector<2x128xf32> to vector<2xf32>
    %50 = vector.shape_cast %49 : vector<2xf32> to vector<2x1xf32>
    %51 = math.log %50 : vector<2x1xf32>
    %52 = arith.addf %45, %51 : vector<2x1xf32>
    %53 = arith.addf %39, %52 : vector<2x1xf32>
    %cst_15 = arith.constant 2.500000e-01 : f32
    %54 = vector.broadcast %cst_15 : f32 to vector<2x128xf32>
    %55 = arith.mulf %43, %54 : vector<2x128xf32>
    %cst_16 = arith.constant dense<0xFF800000> : vector<2xf32>
    %56 = vector.multi_reduction <maximumf>, %55, %cst_16 [1] : vector<2x128xf32> to vector<2xf32>
    %57 = vector.shape_cast %56 : vector<2xf32> to vector<2x1xf32>
    %58 = vector.broadcast %57 : vector<2x1xf32> to vector<2x128xf32>
    %59 = arith.subf %55, %58 : vector<2x128xf32>
    %60 = math.exp %59 : vector<2x128xf32>
    %cst_17 = arith.constant dense<0.000000e+00> : vector<2xf32>
    %61 = vector.multi_reduction <add>, %60, %cst_17 [1] : vector<2x128xf32> to vector<2xf32>
    %62 = vector.shape_cast %61 : vector<2xf32> to vector<2x1xf32>
    %63 = math.log %62 : vector<2x1xf32>
    %64 = arith.addf %57, %63 : vector<2x1xf32>
    %cst_18 = arith.constant 4.000000e+00 : f32
    %65 = vector.broadcast %cst_18 : f32 to vector<2x1xf32>
    %66 = arith.mulf %65, %64 : vector<2x1xf32>
    %67 = arith.subf %53, %66 : vector<2x1xf32>
    %68 = vector.shape_cast %67 : vector<2x1xf32> to vector<1x2x1xf32>
    %cst_19 = arith.constant dense<0.000000e+00> : vector<1xf32>
    %69 = vector.multi_reduction <add>, %68, %cst_19 [1, 2] : vector<1x2x1xf32> to vector<1xf32>
    %70 = vector.shape_cast %69 : vector<1xf32> to vector<1x1x1xf32>
    %71 = vector.extract %70[0, 0, 0] : f32 from vector<1x1x1xf32>
    %c0_20 = arith.constant 0 : index
    %c0_21 = arith.constant 0 : index
    %72 = memref.load %arg2[%c0_20, %c0_21] : memref<1x1xf32, #tpu.memory_space<smem>>
    memref.store %71, %arg2[%c0_20, %c0_21] : memref<1x1xf32, #tpu.memory_space<smem>>
    return
  }
  func.func @transform_0(%arg0: i32) -> (i32, i32) {
    %c0_i32 = arith.constant 0 : i32
    %c0_i32_0 = arith.constant 0 : i32
    return %arg0, %c0_i32 : i32, i32
  }
  func.func @transform_1(%arg0: i32) -> (i32, i32) {
    %c0_i32 = arith.constant 0 : i32
    %c0_i32_0 = arith.constant 0 : i32
    return %arg0, %c0_i32 : i32, i32
  }
}

</mosaic_0001>

<bundles_post_ra>
// kernel: tpu_custom_call.1
= control target key start
LH: loop header
LB: loop body
LE: loop exit
PB: predicated region body
PF: predicated region fallthrough
CT: control target
= control target key end

     0   :  { %6 = vsyncpa [#allocation3], 0  ;;  %s232_s0 = inlined_call_operand.hbm [shape: f32[2,512], index: 0, kind: input, shape index: {}]   ;;  %s233_s1 = inlined_call_operand.hbm [shape: f32[1,1], index: 1, kind: output, shape index: {}]  }
   0x1   :  { %7 = vsyncpa [#allocation4], 0  ;;  %s186_s6 = smov [#allocation2]   ;;  %s150_s10 = scalar_lea.hbm %s232_s0, 128 }
   0x2   :  { %s14_s7 = sshll.u32 %s186_s6, 4  ;;  %p151_p0 = scmp.ne.s32.totalorder %s232_s0, %s150_s10  ;;  %s15_s7 = int_to_ptr.vmem [resolvable:$true] %s14_s7 }
   0x3   :  { %p154_p1 = scmp.lt.u32.totalorder %s150_s10, %s232_s0 }
   0x5   :  { %p156_p2 = pnand %p154_p1, %p151_p0 }
   0x7   :  { %159 = shalt.err (!%p156_p2)
}
   0x8   :  { %s160_s15 = scalar_lea.vmem %s15_s7, 128  ;;  %p165_p4 = scmp.lt.s32.totalorder %s15_s7, %s15_s7 }
   0x9   :  { %p161_p3 = scmp.ne.s32.totalorder %s15_s7, %s160_s15  ;;  %p166_p5 = scmp.lt.s32.totalorder %s160_s15, %s160_s15 }
   0xb   :  { %p167_p6 = por %p166_p5, %p165_p4 }
   0xd   :  { %p168_p7 = pnand %p167_p6, %p161_p3 }
   0xf   :  { %171 = shalt.err (!%p168_p7)
}
  0x10   :  { %17 = dma.hbm_to_vmem [thread:$0]  %s232_s0, 128, %s15_s7, [#allocation3]  }
  0x11   :  { %182 = dma.done.wait [#allocation3], 128  }
  0x12   :  { %183 = vsyncadd [#allocation3], 4294967168  ;;  %vm23_vm0 = vcmask 1041408   ;;  %v21_v0 = vld [vmem:[#allocation2] sm:$0x3]  ;;  %vm99_vm1 = vcmask 1024  }
  0x13   :  { %v52_v1 = vld [vmem:[#allocation2 + $0x4] sm:$0x3]  ;;  %v36_v2 = vld [vmem:[#allocation2 + $0x2] sm:$0x3]  ;;  %v22_v3 = vmul.f32 0.33333334, %v21_v0 }
  0x14   :  { %v53_v4 = vmul.f32 0.33333334, %v52_v1  ;;  %v37_v5 = vmul.f32 0.33333334, %v36_v2  ;;  %v68_v6 = vld [vmem:[#allocation2 + $0x6] sm:$0x3] }
  0x15   :  { %v24_v7 = vsel %vm23_vm0, %v22_v3, -inf  ;;  %v69_v9 = vmul.f32 0.33333334, %v68_v6  ;;  %s172_s20 = scalar_lea.hbm %s233_s1, 16 }
  0x16   :  { %v55_v8 = vsel %vm23_vm0, %v53_v4, -inf  ;;  %25 = vmax.xlane.f32.xlu0 %v24_v7  ;;  %v38_v10 = vadd.f32 %v37_v5, %v22_v3  ;;  %v39_v11 = vsel %vm23_vm0, %v37_v5, -inf  ;;  %p173_p8 = scmp.ne.s32.totalorder %s233_s1, %s172_s20  ;;  %p176_p9 = scmp.lt.u32.totalorder %s172_s20, %s233_s1 }
  0x17   :  { %56 = vmax.xlane.f32.xlu1 %v55_v8  ;;  %v71_v12 = vsel %vm23_vm0, %v69_v9, -inf }
  0x18   :  { %v54_v13 = vadd.f32 %v53_v4, %v38_v10  ;;  %p178_p10 = pnand %p176_p9, %p173_p8 }
  0x1a   :  { %40 = vmax.xlane.f32.xlu0 %v39_v11  ;;  %v70_v14 = vadd.f32 %v69_v9, %v54_v13 }
  0x1b   :  { %72 = vmax.xlane.f32.xlu1 %v71_v12 }
  0x1c   :  { %v84_v15 = vmul.f32 0.25, %v70_v14 }
  0x1e   :  { %v85_v16 = vsel %vm23_vm0, %v84_v15, -inf }
  0x1f   :  { %86 = vmax.xlane.f32.xlu0 %v85_v16 }
  0xa3   :  { %v26_v17 = vpop.xlane.xlu0 %25 }
  0xa4   :  { %v57_v18 = vpop.xlane.xlu1 %56  ;;  %v27_v19 = vsub.f32 %v22_v3, %v26_v17 }
  0xa5   :  { %v58_v20 = vsub.f32 %v53_v4, %v57_v18 }
  0xa6   :  { %v28_v21 = vmul.f32 1.442695, %v27_v19 }
  0xa7   :  { %v59_v22 = vmul.f32 1.442695, %v58_v20  ;;  %v41_v23 = vpop.xlane.xlu0 %40 }
  0xa8   :  { %v73_v24 = vpop.xlane.xlu1 %72  ;;  %130 = vpow2.f32 %v28_v21  ;;  %v42_v25 = vsub.f32 %v37_v5, %v41_v23 }
  0xa9   :  { %v74_v26 = vsub.f32 %v69_v9, %v73_v24  ;;  %132 = vpow2.f32 %v59_v22 }
  0xaa   :  { %v43_v27 = vmul.f32 1.442695, %v42_v25 }
  0xab   :  { %v75_v28 = vmul.f32 1.442695, %v74_v26 }
  0xac   :  { %134 = vpow2.f32 %v43_v27  ;;  %v87_v29 = vpop.xlane.xlu0 %86 }
  0xad   :  { %136 = vpow2.f32 %v75_v28  ;;  %v88_v30 = vsub.f32 %v84_v15, %v87_v29 }
  0xaf   :  { %v89_v31 = vmul.f32 1.442695, %v88_v30 }
  0xb1   :  { %138 = vpow2.f32 %v89_v31 }
  0xb2   :  { %v131_v32 = vpop.eup %130 }
  0xb3   :  { %v133_v33 = vpop.eup %132  ;;  %v30_v34 = vsel %vm23_vm0, %v131_v32, 0.0 }
  0xb4   :  { %31 = vadd.xlane.f32.xlu1 %v30_v34  ;;  %v61_v35 = vsel %vm23_vm0, %v133_v33, 0.0 }
  0xb6   :  { %v135_v36 = vpop.eup %134 }
  0xb7   :  { %v137_v37 = vpop.eup %136  ;;  %v45_v38 = vsel %vm23_vm0, %v135_v36, 0.0 }
  0xb8   :  { %62 = vadd.xlane.f32.xlu1 %v61_v35  ;;  %46 = vadd.xlane.f32.xlu0 %v45_v38  ;;  %v77_v39 = vsel %vm23_vm0, %v137_v37, 0.0 }
  0xbb   :  { %v139_v40 = vpop.eup %138 }
  0xbc   :  { %78 = vadd.xlane.f32.xlu0 %v77_v39  ;;  %v91_v41 = vsel %vm23_vm0, %v139_v40, 0.0 }
  0xbd   :  { %92 = vadd.xlane.f32.xlu1 %v91_v41 }
 0x141   :  { %v32_v42 = vpop.xlane.xlu1 %31 }
 0x142   :  { %140 = vlog2.f32 %v32_v42 }
 0x145   :  { %v63_v43 = vpop.xlane.xlu1 %62  ;;  %v47_v44 = vpop.xlane.xlu0 %46 }
 0x146   :  { %142 = vlog2.f32 %v63_v43 }
 0x147   :  { %144 = vlog2.f32 %v47_v44 }
 0x149   :  { %v79_v45 = vpop.xlane.xlu0 %78 }
 0x14a   :  { %v93_v46 = vpop.xlane.xlu1 %92  ;;  %146 = vlog2.f32 %v79_v45 }
 0x14b   :  { %148 = vlog2.f32 %v93_v46 }
 0x14c   :  { %v141_v47 = vpop.eup %140 }
 0x14d   :  { %v34_v49 = vmul.f32 0.6931472, %v141_v47 }
 0x14f   :  { %v35_v54 = vadd.f32 %v34_v49, %v26_v17 }
 0x150   :  { %v143_v48 = vpop.eup %142 }
 0x151   :  { %v145_v50 = vpop.eup %144  ;;  %v65_v51 = vmul.f32 0.6931472, %v143_v48 }
 0x152   :  { %v49_v52 = vmul.f32 0.6931472, %v145_v50 }
 0x153   :  { %v66_v58 = vadd.f32 %v65_v51, %v57_v18 }
 0x154   :  { %v147_v53 = vpop.eup %146  ;;  %v50_v55 = vadd.f32 %v49_v52, %v41_v23 }
 0x155   :  { %v149_v56 = vpop.eup %148  ;;  %v81_v57 = vmul.f32 0.6931472, %v147_v53 }
 0x156   :  { %v51_v59 = vadd.f32 %v50_v55, %v35_v54  ;;  %v95_v60 = vmul.f32 0.6931472, %v149_v56 }
 0x157   :  { %v82_v61 = vadd.f32 %v81_v57, %v73_v24 }
 0x158   :  { %v96_v62 = vadd.f32 %v95_v60, %v87_v29  ;;  %v67_v63 = vadd.f32 %v66_v58, %v51_v59 }
 0x15a   :  { %v83_v0 = vadd.f32 %v82_v61, %v67_v63  ;;  %v97_v1 = vmul.f32 4.0, %v96_v62 }
 0x15c   :  { %v98_v2 = vsub.f32 %v83_v0, %v97_v1 }
 0x15e   :  { %v100_v3 = vsel %vm99_vm1, %v98_v2, 0.0 }
 0x15f   :  { %101 = vadd.xlane.f32.xlu0 %v100_v3 }
 0x1ec   :  { %v102_v4 = vpop.xlane.xlu0 %101 }
 0x1ed   :  { %v103_v5 = vrot.slane %v102_v4, 4 }
 0x1ef   :  { %v104_v6 = vadd.f32 %v103_v5, %v102_v4 }
 0x1f1   :  { %v105_v7 = vrot.slane %v104_v6, 2 }
 0x1f3   :  { %v106_v8 = vadd.f32 %v105_v7, %v104_v6 }
 0x1f5   :  { %v107_v9 = vrot.slane %v106_v8, 1 }
 0x1f7   :  { %v108_v10 = vadd.f32 %v107_v9, %v106_v8 }
 0x1f9   :  { %126 = vpush %v108_v10 }
 0x22a   :  { %s127_s0 = spop %126 }
 0x22b   :  { %111 = sst [smem:[#allocation5]] %s127_s0 }
 0x22c   :  { %181 = shalt.err (!%p178_p10)
}
 0x22d   :  { %s187_s25 = smov [#allocation5]  }
 0x22e   :  { %119 = dma.smem_to_hbm %s187_s25, 16, %s233_s1, [#allocation4]  }
 0x22f   :  { %184 = dma.done.wait [#allocation4], 16  }
 0x230   :  { %185 = vsyncadd [#allocation4], 4294967280 }
 0x231   :  { %123 = sfence }
 0x232   :  { %124 = vsyncpa [#allocation3], 1 }
 0x233   :  { %125 = vsyncpa [#allocation4], 1 }

</bundles_post_ra>
